<compile_context>
chip_gen: v5e
topology: v5e:2x2
jax: 0.10.0
libtpu: 0.0.40
codegen_flags: <defaults>
</compile_context>

<pallas_src>
import jax
import jax.numpy as jnp
from jax import lax
from jax.experimental import pallas as pl
from jax.experimental.pallas import tpu as pltpu


def _linear_kernel(x_ref, w_ref, o_ref):
    # x_ref: (TM, D) tile, w_ref: (C_pad, D) resident weight, o_ref: (TM, C_pad)
    o_ref[...] = lax.dot_general(
        x_ref[...],
        w_ref[...],
        dimension_numbers=(((1,), (1,)), ((), ())),  # contract D with D (= x @ W.T)
        preferred_element_type=jnp.float32,
    ).astype(o_ref.dtype)


def single_linear(x, weight, *, block_rows=512):
    """y = x @ weight.T (no bias); weight shape = (class_num, dim_node_feat)."""
    n, d = x.shape
    c, d2 = weight.shape
    assert d == d2, "dim mismatch"

    # Lane-dense output: pad class dim up to a multiple of 128 with zero rows.
    c_pad = pl.cdiv(c, 128) * 128
    if c_pad != c:
        weight = jnp.pad(weight, ((0, c_pad - c), (0, 0)))

    # Row tile: multiple-of-8-friendly; 512 keeps the double-buffered working
    # set well under v7x's 32 MiB scoped VMEM for D up to a few thousand.
    tm = min(block_rows, n)
    grid = (pl.cdiv(n, tm),)

    out = pl.pallas_call(
        _linear_kernel,
        out_shape=jax.ShapeDtypeStruct((n, c_pad), x.dtype),
        grid=grid,
        in_specs=[
            pl.BlockSpec((tm, d), lambda i: (i, 0)),      # x: tiled over rows
            pl.BlockSpec((c_pad, d), lambda i: (0, 0)),   # W: resident in VMEM
        ],
        out_specs=pl.BlockSpec((tm, c_pad), lambda i: (i, 0)),
        compiler_params=pltpu.CompilerParams(
            dimension_semantics=("parallel",),
            vmem_limit_bytes=32 * 1024 * 1024,
        ),
    )(x, weight)

    return out[:, :c] if c_pad != c else out


if __name__ == "__main__":
    # Small shapes consistent with the module: N nodes, dim_node_feat, class_num.
    N, DIM_NODE_FEAT, CLASS_NUM = 8, 32, 16

    key = jax.random.PRNGKey(0)
    kx, kw = jax.random.split(key)

    x = jax.random.normal(kx, (N, DIM_NODE_FEAT), dtype=jnp.float32)
    # Deterministic init mimicking torch.nn.Linear default:
    # uniform(-1/sqrt(fan_in), 1/sqrt(fan_in))
    bound = 1.0 / (DIM_NODE_FEAT ** 0.5)
    weight = jax.random.uniform(
        kw, (CLASS_NUM, DIM_NODE_FEAT), dtype=jnp.float32,
        minval=-bound, maxval=bound,
    )

    out = single_linear(x, weight)
    out = jax.block_until_ready(out)

    # Correctness check against plain JAX reference.
    ref = x @ weight.T
    assert out.shape == (N, CLASS_NUM)
    assert jnp.allclose(out, ref, atol=1e-5, rtol=1e-5)

    print("KERNEL_OK")
</pallas_src>

<mosaic_0001>
module attributes {stable_mosaic.version = 11 : i64} {
  func.func @_linear_kernel(%arg0: i32, %arg1: memref<8x32xf32, #tpu.memory_space<vmem>>, %arg2: memref<128x32xf32, #tpu.memory_space<vmem>>, %arg3: memref<8x128xf32, #tpu.memory_space<vmem>>) attributes {dimension_semantics = [#tpu.dimension_semantics<parallel>], iteration_bounds = array<i64: 1>, scalar_prefetch = 0 : i64, scratch_operands = 0 : i64, tpu.core_type = #tpu.core_type<tc>, window_params = [{transform_indices = @transform_0, window_bounds = array<i64: 8, 32>}, {pipeline_mode = #tpu.pipeline_mode<synchronous>, transform_indices = @transform_1, window_bounds = array<i64: 128, 32>}, {transform_indices = @transform_2, window_bounds = array<i64: 8, 128>}]} {
    %c0 = arith.constant 0 : index
    %c0_0 = arith.constant 0 : index
    %0 = vector.load %arg1[%c0, %c0_0] : memref<8x32xf32, #tpu.memory_space<vmem>>, vector<8x32xf32>
    %c0_1 = arith.constant 0 : index
    %c0_2 = arith.constant 0 : index
    %1 = vector.load %arg2[%c0_1, %c0_2] : memref<128x32xf32, #tpu.memory_space<vmem>>, vector<128x32xf32>
    %cst = arith.constant dense<0.000000e+00> : vector<8x128xf32>
    %2 = tpu.matmul %0, %1, %cst {dimension_numbers = #tpu.dot_dimension_numbers<[1], [1], [0], [0], [0, 0, 1, 0], [], []>} : vector<8x32xf32>, vector<128x32xf32>, vector<8x128xf32> -> vector<8x128xf32>
    %c0_3 = arith.constant 0 : index
    %c0_4 = arith.constant 0 : index
    %3 = vector.load %arg3[%c0_3, %c0_4] : memref<8x128xf32, #tpu.memory_space<vmem>>, vector<8x128xf32>
    tpu.vector_store %arg3[%c0_3, %c0_4], %2 {strides = array<i32>} : memref<8x128xf32, #tpu.memory_space<vmem>>, vector<8x128xf32>,
    return
  }
  func.func @transform_0(%arg0: i32) -> (i32, i32) {
    %c0_i32 = arith.constant 0 : i32
    %c0_i32_0 = arith.constant 0 : i32
    return %arg0, %c0_i32 : i32, i32
  }
  func.func @transform_1(%arg0: i32) -> (i32, i32) {
    %c0_i32 = arith.constant 0 : i32
    %c0_i32_0 = arith.constant 0 : i32
    %c0_i32_1 = arith.constant 0 : i32
    return %c0_i32, %c0_i32_0 : i32, i32
  }
  func.func @transform_2(%arg0: i32) -> (i32, i32) {
    %c0_i32 = arith.constant 0 : i32
    %c0_i32_0 = arith.constant 0 : i32
    return %arg0, %c0_i32 : i32, i32
  }
}

</mosaic_0001>

<bundles_post_ra>
// kernel: tpu_custom_call.1
= control target key start
LH: loop header
LB: loop body
LE: loop exit
PB: predicated region body
PF: predicated region fallthrough
CT: control target
= control target key end

     0   :  { %vm29_vm0 = vcmask 261120   ;;  %s249_s0 = inlined_call_operand.vmem [shape: f32[8,32], index: 0, kind: input, shape index: {}]   ;;  %s250_s1 = inlined_call_operand.vmem [shape: f32[128,32], index: 1, kind: input, shape index: {}]   ;;  %s251_s2 = inlined_call_operand.hbm [shape: f32[8,128], index: 2, kind: output, shape index: {}]  }
   0x1   :  { %v28_v0 = vld [vmem:[%s250_s1 + $0x78] sm:$0xff]  ;;  %v27_v1 = vld [vmem:[%s250_s1 + $0x70] sm:$0xff] }
   0x2   :  { %118 = vmatpush.xpose.msk.msra.mxu0 %vm29_vm0, %v28_v0 }
   0x3   :  { %7 = vsyncpa [#allocation3], 0  ;;  %v26_v2 = vld [vmem:[%s250_s1 + $0x68] sm:$0xff]  ;;  %v25_v3 = vld [vmem:[%s250_s1 + $0x60] sm:$0xff]  ;;  %s162_s15 = smov [#allocation2]   ;;  %s109_s19 = sshll.u32 %s251_s2, 4  ;;  %s110_s19 = int_to_ptr.hbm [resolvable:$true] %s109_s19 }
   0x4   :  { %v24_v4 = vld [vmem:[%s250_s1 + $0x58] sm:$0xff]  ;;  %v23_v5 = vld [vmem:[%s250_s1 + $0x50] sm:$0xff]  ;;  %v22_v6 = vld [vmem:[%s250_s1 + $0x48] sm:$0xff]  ;;  %s107_s16 = sshll.u32 %s162_s15, 4  ;;  %s108_s16 = int_to_ptr.vmem [resolvable:$true] %s107_s16 }
   0x5   :  { %v21_v7 = vld [vmem:[%s250_s1 + $0x40] sm:$0xff]  ;;  %v20_v8 = vld [vmem:[%s250_s1 + $0x38] sm:$0xff]  ;;  %v19_v9 = vld [vmem:[%s250_s1 + $0x30] sm:$0xff] }
   0x6   :  { %119 = vmatpush.xpose.msk.msra.mxu0 %vm29_vm0, %v27_v1  ;;  %v18_v10 = vld [vmem:[%s250_s1 + $0x28] sm:$0xff]  ;;  %v17_v11 = vld [vmem:[%s250_s1 + $0x20] sm:$0xff]  ;;  %v16_v12 = vld [vmem:[%s250_s1 + $0x18] sm:$0xff] }
   0x7   :  { %v15_v13 = vld [vmem:[%s250_s1 + $0x10] sm:$0xff]  ;;  %v14_v14 = vld [vmem:[%s250_s1 + $0x8] sm:$0xff]  ;;  %v13_v15 = vld [vmem:[%s250_s1] sm:$0xff] }
   0x8   :  { %v12_v16 = vld [vmem:[%s249_s0] sm:$0xff] }
   0xa   :  { %120 = vmatpush.xpose.msk.msra.mxu0 %vm29_vm0, %v26_v2 }
   0xe   :  { %121 = vmatpush.xpose.msk.msra.mxu0 %vm29_vm0, %v25_v3 }
  0x12   :  { %122 = vmatpush.xpose.msk.msra.mxu0 %vm29_vm0, %v24_v4 }
  0x16   :  { %123 = vmatpush.xpose.msk.msra.mxu0 %vm29_vm0, %v23_v5 }
  0x1a   :  { %124 = vmatpush.xpose.msk.msra.mxu0 %vm29_vm0, %v22_v6 }
  0x1e   :  { %125 = vmatpush.xpose.msk.msra.mxu0 %vm29_vm0, %v21_v7 }
  0x22   :  { %126 = vmatpush.xpose.msk.msra.mxu0 %vm29_vm0, %v20_v8 }
  0x26   :  { %127 = vmatpush.xpose.msk.msra.mxu0 %vm29_vm0, %v19_v9 }
  0x2a   :  { %128 = vmatpush.xpose.msk.msra.mxu0 %vm29_vm0, %v18_v10 }
  0x2e   :  { %129 = vmatpush.xpose.msk.msra.mxu0 %vm29_vm0, %v17_v11 }
  0x32   :  { %130 = vmatpush.xpose.msk.msra.mxu0 %vm29_vm0, %v16_v12 }
  0x36   :  { %131 = vmatpush.xpose.msk.msra.mxu0 %vm29_vm0, %v15_v13 }
  0x3a   :  { %132 = vmatpush.xpose.msk.msra.mxu0 %vm29_vm0, %v14_v14 }
  0x3e   :  { %133 = vmatpush.xpose.msk.msra.mxu0 %vm29_vm0, %v13_v15 }
  0x41   :  { %134 = vmatmul.msk.f32.vlgmr.msra.gmra.mxu0 %vm29_vm0, %v12_v16 }
  0xbe   :  { %v98_v17 = vpop.f32.mrf.mxu0 }
  0xbf   :  { %101 = vst [vmem:[#allocation2] sm:$0xff] %v98_v17 }
  0xc0   :  { %112 = dma.vmem_to_hbm [thread:$0]  %s108_s16, 128, %s110_s19, [#allocation3]  }
  0xc1   :  { %160 = dma.done.wait [#allocation3], 128  }
  0xc2   :  { %161 = vsyncadd [#allocation3], 4294967168 }
  0xc3   :  { %117 = vsyncpa [#allocation3], 1 }

</bundles_post_ra>
